<compile_context>
chip_gen: v7x
topology: tpu7x:2x2x1
jax: 0.10.0
libtpu: 0.0.40
codegen_flags: <defaults>
</compile_context>

<pallas_src>
import jax
import jax.numpy as jnp
from jax.experimental import pallas as pl
from jax.experimental.pallas import tpu as pltpu

HIDDEN = 256


def _round_up(x, m):
    return ((x + m - 1) // m) * m


def _critic_kernel(s_ref, a_ref, w1s_ref, w1a_ref, b1_ref, w2_ref, b2_ref,
                   w3_ref, b3_ref, q_ref):
    # Compute dtype for MXU operands (bf16 in the default fast path, f32 in
    # the exact path); accumulation is always f32 via preferred_element_type.
    cdt = w2_ref.dtype

    # Layer 1: split-K matmul replaces concat([state, action]) @ W1.
    s = s_ref[...].astype(cdt)
    a = a_ref[...].astype(cdt)
    h1 = (jnp.dot(s, w1s_ref[...], preferred_element_type=jnp.float32)
          + jnp.dot(a, w1a_ref[...], preferred_element_type=jnp.float32)
          + b1_ref[...])
    h1 = jnp.maximum(h1, 0.0).astype(cdt)

    # Layer 2: (bt, H) @ (H, H) -- the dominant matmul.
    h2 = jnp.dot(h1, w2_ref[...], preferred_element_type=jnp.float32) + b2_ref[...]
    h2 = jnp.maximum(h2, 0.0).astype(cdt)

    # Layer 3 (H -> 1): contract w3_row (1, H) with h2 (bt, H) along the last
    # dim of both (the flash-attention Q@K^T dimension_numbers).  The MXU
    # consumes the transposed RHS directly -- no XLU transpose of h2 -- and
    # the result is produced in the lane-dense (1, batch_tile) layout, so the
    # output store is a handful of unmasked full-lane vst's.
    q_row = jax.lax.dot_general(
        w3_ref[...], h2,
        dimension_numbers=(((1,), (1,)), ((), ())),
        preferred_element_type=jnp.float32,
    )                                                   # (1, batch_tile)
    q_ref[...] = (q_row + b3_ref[...]).astype(q_ref.dtype)


def critic_forward(state, action, params, *, batch_tile=None, precision="bf16"):
    """state: [B, S], action: [B, A]  ->  q: [B, 1]  (float32).

    precision="bf16": bf16 MXU operands, f32 accumulation (fast path).
    precision="f32" : exact float32 matmuls (matches the PyTorch module).
    """
    B, S = state.shape
    _, A = action.shape
    w1, b1, w2, b2, w3, b3 = params
    H = w1.shape[1]

    # Tile choice:
    #   * B <= 128         : single full-batch block (grid = 1; work is tiny).
    #   * 128 < B <= 4096  : ~half the batch, rounded up to 128 lanes, so the
    #                        grid is >= 2 and both v7x TensorCores are busy.
    #   * B > 4096         : 2048-row tiles -- big enough to amortize the
    #                        ~0.35 us per-step overhead, small enough that the
    #                        (bt, 256) f32 temporaries stay at ~2 MB each.
    if batch_tile is None:
        if B <= 128:
            batch_tile = B
        elif B <= 4096:
            batch_tile = _round_up(pl.cdiv(B, 2), 128)
        else:
            batch_tile = 2048

    # No input padding: cdiv grid + masked stores on the partial last block.
    grid = (pl.cdiv(B, batch_tile),)

    # One-time (wrapper-side) parameter re-layouts; all tiny / free.
    w1_s = w1[:S]                 # (S, H)
    w1_a = w1[S:]                 # (A, H)
    w3_row = w3.reshape(1, H)     # (H, 1) -> (1, H), same memory order
    if precision == "bf16":
        w1_s = w1_s.astype(jnp.bfloat16)
        w1_a = w1_a.astype(jnp.bfloat16)
        w2 = w2.astype(jnp.bfloat16)
        w3_row = w3_row.astype(jnp.bfloat16)
    # Biases stay f32 (added to the f32 accumulators).

    # Weights/biases: whole-array VMEM residents (no block_shape / index_map),
    # so they are DMA'd once and never double-buffered across grid steps.
    resident = pl.BlockSpec(memory_space=pltpu.MemorySpace.VMEM)

    q_rows = pl.pallas_call(
        _critic_kernel,
        out_shape=jax.ShapeDtypeStruct((1, B), jnp.float32),
        grid_spec=pltpu.PrefetchScalarGridSpec(
            num_scalar_prefetch=0,
            grid=grid,
            in_specs=[
                pl.BlockSpec((batch_tile, S), lambda i: (i, 0)),   # state tile
                pl.BlockSpec((batch_tile, A), lambda i: (i, 0)),   # action tile
                resident,   # w1_s
                resident,   # w1_a
                resident,   # b1
                resident,   # w2
                resident,   # b2
                resident,   # w3 row
                resident,   # b3
            ],
            # Lane-dense output: each grid step writes a (1, batch_tile) row;
            # only the final partial block (if any) uses masked stores.
            out_specs=pl.BlockSpec((1, batch_tile), lambda i: (0, i)),
        ),
        compiler_params=pltpu.CompilerParams(
            dimension_semantics=("parallel",),
            vmem_limit_bytes=32 * 1024 * 1024,
        ),
    )(state, action, w1_s, w1_a, b1, w2, b2, w3_row, b3)

    # Free layout plumbing back to the module's (B, 1) output.
    return q_rows.reshape(B, 1)


def init_critic_params(key, state_dim, action_dim, hidden=HIDDEN):
    """Deterministic init mirroring PyTorch nn.Linear default (U[-1/sqrt(fan_in), 1/sqrt(fan_in)])."""
    din = state_dim + action_dim
    ks = jax.random.split(key, 6)

    def uni(k, shape, fan_in):
        bound = 1.0 / jnp.sqrt(jnp.float32(fan_in))
        return jax.random.uniform(k, shape, jnp.float32, -bound, bound)

    w1 = uni(ks[0], (din, hidden), din)
    b1 = uni(ks[1], (1, hidden), din)
    w2 = uni(ks[2], (hidden, hidden), hidden)
    b2 = uni(ks[3], (1, hidden), hidden)
    w3 = uni(ks[4], (hidden, 1), hidden)
    b3 = uni(ks[5], (1, 1), hidden)
    return (w1, b1, w2, b2, w3, b3)


def critic_reference(state, action, params):
    w1, b1, w2, b2, w3, b3 = params
    x = jnp.concatenate([state, action], axis=1)
    h1 = jnp.maximum(x @ w1 + b1, 0.0)
    h2 = jnp.maximum(h1 @ w2 + b2, 0.0)
    return h2 @ w3 + b3


if __name__ == "__main__":
    key = jax.random.PRNGKey(0)
    k_param, k_state, k_action = jax.random.split(key, 3)

    # Small test: exact f32 path, single-block grid.
    batch, state_dim, action_dim = 8, 16, 8
    params = init_critic_params(k_param, state_dim, action_dim)
    state = jax.random.normal(k_state, (batch, state_dim), jnp.float32)
    action = jax.random.normal(k_action, (batch, action_dim), jnp.float32)

    q32 = jax.block_until_ready(critic_forward(state, action, params, precision="f32"))
    q_ref = critic_reference(state, action, params)
    assert q32.shape == (batch, 1)
    assert jnp.allclose(q32, q_ref, atol=1e-4, rtol=1e-4), "f32 path mismatch vs pure-JAX reference"

    # Medium test: default bf16 fast path, grid of 2 with a partial last block
    # (exercises the no-pad / masked-store path).  Looser tolerance because
    # the MXU operands are bf16 (accumulation stays f32).
    batch2 = 300
    ks2, ka2 = jax.random.split(jax.random.PRNGKey(1), 2)
    state2 = jax.random.normal(ks2, (batch2, state_dim), jnp.float32)
    action2 = jax.random.normal(ka2, (batch2, action_dim), jnp.float32)

    qbf = jax.block_until_ready(critic_forward(state2, action2, params))
    q_ref2 = critic_reference(state2, action2, params)
    assert qbf.shape == (batch2, 1)
    assert jnp.allclose(qbf, q_ref2, atol=1e-1, rtol=1e-1), "bf16 path mismatch vs pure-JAX reference"

    print("KERNEL_OK")
</pallas_src>

<mosaic_0001>
module attributes {stable_mosaic.version = 11 : i64} {
  func.func @_critic_kernel(%arg0: i32, %arg1: memref<8x16xf32, #tpu.memory_space<vmem>>, %arg2: memref<8x8xf32, #tpu.memory_space<vmem>>, %arg3: memref<16x256xf32, #tpu.memory_space<vmem>>, %arg4: memref<8x256xf32, #tpu.memory_space<vmem>>, %arg5: memref<1x256xf32, #tpu.memory_space<vmem>>, %arg6: memref<256x256xf32, #tpu.memory_space<vmem>>, %arg7: memref<1x256xf32, #tpu.memory_space<vmem>>, %arg8: memref<1x256xf32, #tpu.memory_space<vmem>>, %arg9: memref<1x1xf32, #tpu.memory_space<vmem>>, %arg10: memref<1x8xf32, #tpu.memory_space<vmem>>) attributes {dimension_semantics = [#tpu.dimension_semantics<parallel>], iteration_bounds = array<i64: 1>, scalar_prefetch = 0 : i64, scratch_operands = 0 : i64, tpu.core_type = #tpu.core_type<tc>, window_params = [{transform_indices = @transform_0, window_bounds = array<i64: 8, 16>}, {transform_indices = @transform_1, window_bounds = array<i64: 8, 8>}, {pipeline_mode = #tpu.pipeline_mode<synchronous>, transform_indices = @transform_2, window_bounds = array<i64: 16, 256>}, {pipeline_mode = #tpu.pipeline_mode<synchronous>, transform_indices = @transform_3, window_bounds = array<i64: 8, 256>}, {pipeline_mode = #tpu.pipeline_mode<synchronous>, transform_indices = @transform_4, window_bounds = array<i64: 1, 256>}, {pipeline_mode = #tpu.pipeline_mode<synchronous>, transform_indices = @transform_5, window_bounds = array<i64: 256, 256>}, {pipeline_mode = #tpu.pipeline_mode<synchronous>, transform_indices = @transform_6, window_bounds = array<i64: 1, 256>}, {pipeline_mode = #tpu.pipeline_mode<synchronous>, transform_indices = @transform_7, window_bounds = array<i64: 1, 256>}, {pipeline_mode = #tpu.pipeline_mode<synchronous>, transform_indices = @transform_8, window_bounds = array<i64: 1, 1>}, {transform_indices = @transform_9, window_bounds = array<i64: 1, 8>}]} {
    %c0 = arith.constant 0 : index
    %c0_0 = arith.constant 0 : index
    %0 = vector.load %arg1[%c0, %c0_0] : memref<8x16xf32, #tpu.memory_space<vmem>>, vector<8x16xf32>
    %c0_1 = arith.constant 0 : index
    %c0_2 = arith.constant 0 : index
    %1 = vector.load %arg2[%c0_1, %c0_2] : memref<8x8xf32, #tpu.memory_space<vmem>>, vector<8x8xf32>
    %c0_3 = arith.constant 0 : index
    %c0_4 = arith.constant 0 : index
    %2 = vector.load %arg3[%c0_3, %c0_4] : memref<16x256xf32, #tpu.memory_space<vmem>>, vector<16x256xf32>
    %cst = arith.constant dense<0.000000e+00> : vector<8x256xf32>
    %3 = tpu.matmul %0, %2, %cst {dimension_numbers = #tpu.dot_dimension_numbers<[1], [0], [0], [1], [0, 0, 1, 1], [], []>} : vector<8x16xf32>, vector<16x256xf32>, vector<8x256xf32> -> vector<8x256xf32>
    %c0_5 = arith.constant 0 : index
    %c0_6 = arith.constant 0 : index
    %4 = vector.load %arg4[%c0_5, %c0_6] : memref<8x256xf32, #tpu.memory_space<vmem>>, vector<8x256xf32>
    %cst_7 = arith.constant dense<0.000000e+00> : vector<8x256xf32>
    %5 = tpu.matmul %1, %4, %cst_7 {dimension_numbers = #tpu.dot_dimension_numbers<[1], [0], [0], [1], [0, 0, 1, 1], [], []>} : vector<8x8xf32>, vector<8x256xf32>, vector<8x256xf32> -> vector<8x256xf32>
    %6 = arith.addf %3, %5 : vector<8x256xf32>
    %c0_8 = arith.constant 0 : index
    %c0_9 = arith.constant 0 : index
    %7 = vector.load %arg5[%c0_8, %c0_9] : memref<1x256xf32, #tpu.memory_space<vmem>>, vector<1x256xf32>
    %8 = vector.broadcast %7 : vector<1x256xf32> to vector<8x256xf32>
    %9 = arith.addf %6, %8 : vector<8x256xf32>
    %cst_10 = arith.constant 0.000000e+00 : f32
    %10 = vector.broadcast %cst_10 : f32 to vector<8x256xf32>
    %11 = arith.maximumf %9, %10 : vector<8x256xf32>
    %c0_11 = arith.constant 0 : index
    %c0_12 = arith.constant 0 : index
    %12 = vector.load %arg6[%c0_11, %c0_12] : memref<256x256xf32, #tpu.memory_space<vmem>>, vector<256x256xf32>
    %cst_13 = arith.constant dense<0.000000e+00> : vector<8x256xf32>
    %13 = tpu.matmul %11, %12, %cst_13 {dimension_numbers = #tpu.dot_dimension_numbers<[1], [0], [0], [1], [0, 0, 1, 1], [], []>} : vector<8x256xf32>, vector<256x256xf32>, vector<8x256xf32> -> vector<8x256xf32>
    %c0_14 = arith.constant 0 : index
    %c0_15 = arith.constant 0 : index
    %14 = vector.load %arg7[%c0_14, %c0_15] : memref<1x256xf32, #tpu.memory_space<vmem>>, vector<1x256xf32>
    %15 = vector.broadcast %14 : vector<1x256xf32> to vector<8x256xf32>
    %16 = arith.addf %13, %15 : vector<8x256xf32>
    %cst_16 = arith.constant 0.000000e+00 : f32
    %17 = vector.broadcast %cst_16 : f32 to vector<8x256xf32>
    %18 = arith.maximumf %16, %17 : vector<8x256xf32>
    %c0_17 = arith.constant 0 : index
    %c0_18 = arith.constant 0 : index
    %19 = vector.load %arg8[%c0_17, %c0_18] : memref<1x256xf32, #tpu.memory_space<vmem>>, vector<1x256xf32>
    %cst_19 = arith.constant dense<0.000000e+00> : vector<1x8xf32>
    %20 = tpu.matmul %19, %18, %cst_19 {dimension_numbers = #tpu.dot_dimension_numbers<[1], [1], [0], [0], [0, 0, 1, 0], [], []>} : vector<1x256xf32>, vector<8x256xf32>, vector<1x8xf32> -> vector<1x8xf32>
    %c0_20 = arith.constant 0 : index
    %c0_21 = arith.constant 0 : index
    %21 = vector.load %arg9[%c0_20, %c0_21] : memref<1x1xf32, #tpu.memory_space<vmem>>, vector<1x1xf32>
    %22 = vector.broadcast %21 : vector<1x1xf32> to vector<1x8xf32>
    %23 = arith.addf %20, %22 : vector<1x8xf32>
    %c0_22 = arith.constant 0 : index
    %c0_23 = arith.constant 0 : index
    %24 = vector.load %arg10[%c0_22, %c0_23] : memref<1x8xf32, #tpu.memory_space<vmem>>, vector<1x8xf32>
    tpu.vector_store %arg10[%c0_22, %c0_23], %23 {strides = array<i32>} : memref<1x8xf32, #tpu.memory_space<vmem>>, vector<1x8xf32>,
    return
  }
  func.func @transform_0(%arg0: i32) -> (i32, i32) {
    %c0_i32 = arith.constant 0 : i32
    %c0_i32_0 = arith.constant 0 : i32
    return %arg0, %c0_i32 : i32, i32
  }
  func.func @transform_1(%arg0: i32) -> (i32, i32) {
    %c0_i32 = arith.constant 0 : i32
    %c0_i32_0 = arith.constant 0 : i32
    return %arg0, %c0_i32 : i32, i32
  }
  func.func @transform_2(%arg0: i32) -> (i32, i32) {
    %c0_i32 = arith.constant 0 : i32
    %c0_i32_0 = arith.constant 0 : i32
    %c0_i32_1 = arith.constant 0 : i32
    return %c0_i32, %c0_i32_0 : i32, i32
  }
  func.func @transform_3(%arg0: i32) -> (i32, i32) {
    %c0_i32 = arith.constant 0 : i32
    %c0_i32_0 = arith.constant 0 : i32
    %c0_i32_1 = arith.constant 0 : i32
    return %c0_i32, %c0_i32_0 : i32, i32
  }
  func.func @transform_4(%arg0: i32) -> (i32, i32) {
    %c0_i32 = arith.constant 0 : i32
    %c0_i32_0 = arith.constant 0 : i32
    %c0_i32_1 = arith.constant 0 : i32
    return %c0_i32, %c0_i32_0 : i32, i32
  }
  func.func @transform_5(%arg0: i32) -> (i32, i32) {
    %c0_i32 = arith.constant 0 : i32
    %c0_i32_0 = arith.constant 0 : i32
    %c0_i32_1 = arith.constant 0 : i32
    return %c0_i32, %c0_i32_0 : i32, i32
  }
  func.func @transform_6(%arg0: i32) -> (i32, i32) {
    %c0_i32 = arith.constant 0 : i32
    %c0_i32_0 = arith.constant 0 : i32
    %c0_i32_1 = arith.constant 0 : i32
    return %c0_i32, %c0_i32_0 : i32, i32
  }
  func.func @transform_7(%arg0: i32) -> (i32, i32) {
    %c0_i32 = arith.constant 0 : i32
    %c0_i32_0 = arith.constant 0 : i32
    %c0_i32_1 = arith.constant 0 : i32
    return %c0_i32, %c0_i32_0 : i32, i32
  }
  func.func @transform_8(%arg0: i32) -> (i32, i32) {
    %c0_i32 = arith.constant 0 : i32
    %c0_i32_0 = arith.constant 0 : i32
    %c0_i32_1 = arith.constant 0 : i32
    return %c0_i32, %c0_i32_0 : i32, i32
  }
  func.func @transform_9(%arg0: i32) -> (i32, i32) {
    %c0_i32 = arith.constant 0 : i32
    %c0_i32_0 = arith.constant 0 : i32
    return %c0_i32, %arg0 : i32, i32
  }
}

</mosaic_0001>

<bundles_post_ra>
// kernel: tpu_custom_call.1
= control target key start
LH: loop header
LB: loop body
LE: loop exit
PB: predicated region body
PF: predicated region fallthrough
CT: control target
= control target key end

     0   :  { %s905_s0 = inlined_call_operand.hbm [shape: f32[8,16], index: 0, kind: input, shape index: {}]   ;;  %s906_s1 = inlined_call_operand.hbm [shape: f32[8,8], index: 1, kind: input, shape index: {}]   ;;  %s907_s2 = inlined_call_operand.hbm [shape: f32[16,256], index: 2, kind: input, shape index: {}]   ;;  %s908_s3 = inlined_call_operand.hbm [shape: f32[8,256], index: 3, kind: input, shape index: {}]   ;;  %s909_s4 = inlined_call_operand.vmem [shape: f32[1,256], index: 4, kind: input, shape index: {}]   ;;  %s910_s5 = inlined_call_operand.hbm [shape: f32[256,256], index: 5, kind: input, shape index: {}]   ;;  %s911_s6 = inlined_call_operand.vmem [shape: f32[1,256], index: 6, kind: input, shape index: {}]   ;;  %s912_s7 = inlined_call_operand.vmem [shape: f32[1,256], index: 7, kind: input, shape index: {}]   ;;  %s913_s8 = inlined_call_operand.<no memory space> [shape: f32[1,1], index: 8, kind: input, shape index: {}]   ;;  %s914_s9 = inlined_call_operand.hbm [shape: f32[1,8], index: 9, kind: output, shape index: {}]  }
   0x1   :  { %v14_v0 = vstv %s913_s8 }
   0x2   :  { %15 = vst [vmem:[#allocation2] sm:$0x1] %v14_v0 }
   0x3   :  { %16 = vsyncpa [#allocation4], 0 }
   0x4   :  { %17 = vsyncpa [#allocation7], 0 }
   0x5   :  { %18 = vsyncpa [#allocation10], 0 }
   0x6   :  { %19 = vsyncpa [#allocation5], 0  ;;  %s754_s11 = smov [#allocation6]   ;;  %s755_s13 = smov [#allocation9]  }
   0x7   :  { %s36_s12 = sshll.u32 %s754_s11, 4  ;;  %s58_s14 = sshll.u32 %s755_s13, 4  ;;  %s37_s12 = int_to_ptr.vmem [resolvable:$true] %s36_s12  ;;  %s59_s14 = int_to_ptr.vmem [resolvable:$true] %s58_s14 }
   0x8   :  { %s614_s17 = scalar_lea.hbm %s906_s1, 128 }
   0x9   :  { %p615_p0 = scmp.ne.s32.totalorder %s906_s1, %s614_s17  ;;  %p618_p1 = scmp.lt.u32.totalorder %s614_s17, %s906_s1 }
   0xb   :  { %p620_p2 = pnand %p618_p1, %p615_p0 }
   0xd   :  { %623 = shalt.err (!%p620_p2)
}
   0xe   :  { %s624_s21 = scalar_lea.vmem %s37_s12, 128  ;;  %p629_p4 = scmp.lt.s32.totalorder %s37_s12, %s37_s12 }
   0xf   :  { %p625_p3 = scmp.ne.s32.totalorder %s37_s12, %s624_s21  ;;  %p630_p5 = scmp.lt.s32.totalorder %s624_s21, %s624_s21 }
  0x11   :  { %p631_p6 = por %p630_p5, %p629_p4 }
  0x13   :  { %p632_p7 = pnand %p631_p6, %p625_p3 }
  0x15   :  { %635 = shalt.err (!%p632_p7)
}
  0x16   :  { %39 = dma.hbm_to_vmem [thread:$0]  %s906_s1, 128, %s37_s12, [#allocation7]  }
  0x17   :  { %s636_s26 = scalar_lea.hbm %s908_s3, 256 }
  0x18   :  { %p637_p8 = scmp.ne.s32.totalorder %s908_s3, %s636_s26  ;;  %p640_p9 = scmp.lt.u32.totalorder %s636_s26, %s908_s3 }
  0x1a   :  { %p642_p10 = pnand %p640_p9, %p637_p8 }
  0x1c   :  { %645 = shalt.err (!%p642_p10)
}
  0x1d   :  { %s646_s10 = scalar_lea.vmem %s59_s14, 256  ;;  %p651_p12 = scmp.lt.s32.totalorder %s59_s14, %s59_s14 }
  0x1e   :  { %p647_p11 = scmp.ne.s32.totalorder %s59_s14, %s646_s10  ;;  %p652_p13 = scmp.lt.s32.totalorder %s646_s10, %s646_s10 }
  0x20   :  { %p653_p0 = por %p652_p13, %p651_p12 }
  0x22   :  { %p654_p1 = pnand %p653_p0, %p647_p11 }
  0x24   :  { %657 = shalt.err (!%p654_p1)
}
  0x25   :  { %61 = dma.hbm_to_vmem [thread:$0]  %s908_s3, 256, %s59_s14, [#allocation10]  }
  0x26   :  { %s756_s12 = smov [#allocation3]   ;;  %s757_s15 = smov [#allocation8]  }
  0x27   :  { %s26_s13 = sshll.u32 %s756_s12, 4  ;;  %s45_s16 = sshll.u32 %s757_s15, 4  ;;  %s27_s13 = int_to_ptr.vmem [resolvable:$true] %s26_s13  ;;  %s841_s16 = int_to_ptr.vmem [resolvable:$true] %s45_s16 }
  0x28   :  { %s658_s19 = scalar_lea.hbm %s905_s0, 128 }
  0x29   :  { %p659_p2 = scmp.ne.s32.totalorder %s905_s0, %s658_s19  ;;  %p662_p3 = scmp.lt.u32.totalorder %s658_s19, %s905_s0 }
  0x2b   :  { %p664_p4 = pnand %p662_p3, %p659_p2 }
  0x2d   :  { %667 = shalt.err (!%p664_p4)
}
  0x2e   :  { %s668_s3 = scalar_lea.vmem %s27_s13, 128  ;;  %p673_p6 = scmp.lt.s32.totalorder %s27_s13, %s27_s13 }
  0x2f   :  { %p669_p5 = scmp.ne.s32.totalorder %s27_s13, %s668_s3  ;;  %p674_p7 = scmp.lt.s32.totalorder %s668_s3, %s668_s3 }
  0x31   :  { %p675_p8 = por %p674_p7, %p673_p6 }
  0x33   :  { %p676_p9 = pnand %p675_p8, %p669_p5 }
  0x35   :  { %679 = shalt.err (!%p676_p9)
}
  0x36   :  { %29 = dma.hbm_to_vmem [thread:$0]  %s905_s0, 128, %s27_s13, [#allocation4]  }
  0x37   :  { %s680_s26 = scalar_lea.hbm %s907_s2, 512 }
  0x38   :  { %p681_p10 = scmp.ne.s32.totalorder %s907_s2, %s680_s26  ;;  %p684_p11 = scmp.lt.u32.totalorder %s680_s26, %s907_s2 }
  0x3a   :  { %p686_p12 = pnand %p684_p11, %p681_p10 }
  0x3c   :  { %689 = shalt.err (!%p686_p12)
}
  0x3d   :  { %s690_s10 = scalar_lea.vmem %s841_s16, 512  ;;  %p695_p0 = scmp.lt.s32.totalorder %s841_s16, %s841_s16 }
  0x3e   :  { %p691_p13 = scmp.ne.s32.totalorder %s841_s16, %s690_s10  ;;  %p696_p1 = scmp.lt.s32.totalorder %s690_s10, %s690_s10 }
  0x40   :  { %p697_p2 = por %p696_p1, %p695_p0 }
  0x42   :  { %p698_p3 = pnand %p697_p2, %p691_p13 }
  0x44   :  { %701 = shalt.err (!%p698_p3)
}
  0x45   :  { %s758_s0 = smov 256   ;;  %s759_s1 = smov 16  }
  0x46   :  { %51 = dma.hbm_to_vmem [thread:$0]  %s907_s2, 512, %s841_s16, [#allocation7], %s758_s0, %s758_s0, %s759_s1  }
  0x47   :  { %s760_s13 = smov [#allocation11]   ;;  %s702_s19 = scalar_lea.hbm %s910_s5, 8192 }
  0x48   :  { %s69_s15 = sshll.u32 %s760_s13, 4  ;;  %p703_p4 = scmp.ne.s32.totalorder %s910_s5, %s702_s19  ;;  %s70_s15 = int_to_ptr.vmem [resolvable:$true] %s69_s15 }
  0x49   :  { %p706_p5 = scmp.lt.u32.totalorder %s702_s19, %s910_s5 }
  0x4b   :  { %p708_p6 = pnand %p706_p5, %p703_p4 }
  0x4d   :  { %711 = shalt.err (!%p708_p6)
}
  0x4e   :  { %s712_s3 = scalar_lea.vmem %s70_s15, 8192  ;;  %p717_p8 = scmp.lt.s32.totalorder %s70_s15, %s70_s15 }
  0x4f   :  { %p713_p7 = scmp.ne.s32.totalorder %s70_s15, %s712_s3  ;;  %p718_p9 = scmp.lt.s32.totalorder %s712_s3, %s712_s3 }
  0x51   :  { %p719_p10 = por %p718_p9, %p717_p8 }
  0x53   :  { %p720_p11 = pnand %p719_p10, %p713_p7 }
  0x55   :  { %723 = shalt.err (!%p720_p11)
}
  0x56   :  { %75 = dma.hbm_to_vmem [thread:$0]  %s910_s5, 8192, %s70_s15, [#allocation10], %s758_s0, %s758_s0, %s759_s1  }
  0x57   :  { %746 = dma.done.wait [#allocation4], 128  }
  0x58   :  { %747 = vsyncadd [#allocation4], 4294967168 }
  0x59   :  { %748 = dma.done.wait [#allocation7], 640  }
  0x5a   :  { %749 = vsyncadd [#allocation7], 4294966656 }
  0x5b   :  { %750 = dma.done.wait [#allocation10], 8448  }
  0x5c   :  { %751 = vsyncadd [#allocation10], 4294958848  ;;  %v761_v1 = vmov 0.0   ;;  %v104_v2 = vld [vmem:[#allocation9 + $0x8] sm:$0xff]  ;;  %v103_v3 = vld [vmem:[#allocation9] sm:$0xff]  ;;  %vm105_vm0 = vcmask 64512  }
  0x5d   :  { %173 = vmatprep.mubr.f32.mxu0 %v761_v1  ;;  %v98_v4 = vld [vmem:[#allocation6] sm:$0xff]  ;;  %109 = vmatprep.subr.mxu0 %v104_v2  ;;  %v100_v5 = vld [vmem:[#allocation8 + $0x8] sm:$0xff]  ;;  %v99_v7 = vld [vmem:[#allocation8] sm:$0xff]  ;;  %vm180_vm1 = vcmask 130048   ;;  %vm512_vm2 = vcmask 57344  }
  0x5e   :  { %v102_v6 = vld [vmem:[#allocation8 + $0x18] sm:$0xff]  ;;  %110 = vmatpush1.msra.mxu0 %v103_v3  ;;  %v101_v9 = vld [vmem:[#allocation8 + $0x10] sm:$0xff]  ;;  %v274_v12 = vld [vmem:[#allocation11 + $0x18] sm:$0xff] }
  0x5f   :  { %v533_v8 = vpack.c.bf16 %v102_v6, %v100_v5  ;;  %v272_v10 = vld [vmem:[#allocation11 + $0x8] sm:$0xff]  ;;  %531 = vmatmul.mubr.msk.f32.vlgmr.msra.gmra.mrb[0].mxu0 %vm105_vm0, %v98_v4  ;;  %v535_v11 = vpack.c.bf16 %v101_v9, %v99_v7  ;;  %v271_v13 = vld [vmem:[#allocation11] sm:$0xff]  ;;  %v273_v14 = vld [vmem:[#allocation11 + $0x10] sm:$0xff] }
  0x60   :  { %248 = vmatprep.mubr.f32.mxu0 %v761_v1  ;;  %v537_v15 = vpack.c.bf16 %v274_v12, %v272_v10  ;;  %v539_v16 = vpack.c.bf16 %v273_v14, %v271_v13  ;;  %v276_v17 = vld [vmem:[#allocation11 + $0x28] sm:$0xff]  ;;  %v278_v18 = vld [vmem:[#allocation11 + $0x38] sm:$0xff]  ;;  %v275_v19 = vld [vmem:[#allocation11 + $0x20] sm:$0xff] }
  0x61   :  { %534 = vmatprep.subr.bf16.mxu0 %v533_v8  ;;  %v541_v20 = vpack.c.bf16 %v278_v18, %v276_v17  ;;  %v277_v21 = vld [vmem:[#allocation11 + $0x30] sm:$0xff]  ;;  %v280_v22 = vld [vmem:[#allocation11 + $0x48] sm:$0xff]  ;;  %v282_v23 = vld [vmem:[#allocation11 + $0x58] sm:$0xff] }
  0x62   :  { %536 = vmatpush1.bf16.msra.mxu0 %v535_v11  ;;  %538 = vmatprep.subr.bf16.mxu1 %v537_v15  ;;  %v543_v24 = vpack.c.bf16 %v277_v21, %v275_v19  ;;  %v97_v25 = vld [vmem:[#allocation3] sm:$0xff]  ;;  %v545_v26 = vpack.c.bf16 %v282_v23, %v280_v22  ;;  %v281_v28 = vld [vmem:[#allocation11 + $0x50] sm:$0xff]  ;;  %v284_v29 = vld [vmem:[#allocation11 + $0x68] sm:$0xff] }
  0x63   :  { %540 = vmatpush1.bf16.msra.mxu1 %v539_v16  ;;  %v279_v27 = vld [vmem:[#allocation11 + $0x40] sm:$0xff]  ;;  %v286_v30 = vld [vmem:[#allocation11 + $0x78] sm:$0xff]  ;;  %v285_v34 = vld [vmem:[#allocation11 + $0x70] sm:$0xff] }
  0x64   :  { %542 = vmatprep.subr.bf16.mxu1 %v541_v20  ;;  %v547_v31 = vpack.c.bf16 %v281_v28, %v279_v27  ;;  %v549_v32 = vpack.c.bf16 %v286_v30, %v284_v29  ;;  %v283_v33 = vld [vmem:[#allocation11 + $0x60] sm:$0xff]  ;;  %v288_v35 = vld [vmem:[#allocation11 + $0x88] sm:$0xff]  ;;  %v290_v36 = vld [vmem:[#allocation11 + $0x98] sm:$0xff] }
  0x65   :  { %v551_v37 = vpack.c.bf16 %v285_v34, %v283_v33  ;;  %v553_v38 = vpack.c.bf16 %v290_v36, %v288_v35  ;;  %v287_v39 = vld [vmem:[#allocation11 + $0x80] sm:$0xff]  ;;  %v289_v40 = vld [vmem:[#allocation11 + $0x90] sm:$0xff]  ;;  %v292_v41 = vld [vmem:[#allocation11 + $0xa8] sm:$0xff] }
  0x66   :  { %v294_v42 = vld [vmem:[#allocation11 + $0xb8] sm:$0xff]  ;;  %v555_v43 = vpack.c.bf16 %v289_v40, %v287_v39  ;;  %v291_v45 = vld [vmem:[#allocation11 + $0xa0] sm:$0xff]  ;;  %v293_v46 = vld [vmem:[#allocation11 + $0xb0] sm:$0xff] }
  0x67   :  { %532 = vmatmul.mubr.msk.f32.vlgmr.msra.gmra.mrb[0].mxu0 %vm180_vm1, %v97_v25  ;;  %544 = vmatpush1.bf16.msra.mxu1 %v543_v24  ;;  %v557_v44 = vpack.c.bf16 %v294_v42, %v292_v41  ;;  %v296_v47 = vld [vmem:[#allocation11 + $0xc8] sm:$0xff]  ;;  %v298_v48 = vld [vmem:[#allocation11 + $0xd8] sm:$0xff]  ;;  %v559_v49 = vpack.c.bf16 %v293_v46, %v291_v45  ;;  %v295_v51 = vld [vmem:[#allocation11 + $0xc0] sm:$0xff] }
  0x68   :  { %546 = vmatprep.subr.bf16.mxu1 %v545_v26  ;;  %v561_v50 = vpack.c.bf16 %v298_v48, %v296_v47  ;;  %v297_v52 = vld [vmem:[#allocation11 + $0xd0] sm:$0xff]  ;;  %v300_v53 = vld [vmem:[#allocation11 + $0xe8] sm:$0xff]  ;;  %v302_v54 = vld [vmem:[#allocation11 + $0xf8] sm:$0xff] }
  0x69   :  { %v563_v55 = vpack.c.bf16 %v297_v52, %v295_v51  ;;  %v565_v56 = vpack.c.bf16 %v302_v54, %v300_v53  ;;  %v299_v57 = vld [vmem:[#allocation11 + $0xe0] sm:$0xff]  ;;  %v301_v58 = vld [vmem:[#allocation11 + $0xf0] sm:$0xff]  ;;  %v304_v59 = vld [vmem:[#allocation11 + $0x108] sm:$0xff] }
  0x6a   :  { %v306_v60 = vld [vmem:[#allocation11 + $0x118] sm:$0xff]  ;;  %v567_v61 = vpack.c.bf16 %v301_v58, %v299_v57  ;;  %v303_v63 = vld [vmem:[#allocation11 + $0x100] sm:$0xff]  ;;  %v305_v0 = vld [vmem:[#allocation11 + $0x110] sm:$0xff] }
  0x6b   :  { %548 = vmatpush1.bf16.msra.mxu1 %v547_v31  ;;  %v569_v62 = vpack.c.bf16 %v306_v60, %v304_v59  ;;  %v308_v1 = vld [vmem:[#allocation11 + $0x128] sm:$0xff]  ;;  %v310_v2 = vld [vmem:[#allocation11 + $0x138] sm:$0xff]  ;;  %v571_v3 = vpack.c.bf16 %v305_v0, %v303_v63  ;;  %v307_v5 = vld [vmem:[#allocation11 + $0x120] sm:$0xff]  ;;  %v762_v60 = vmov 0  }
  0x6c   :  { %550 = vmatprep.subr.bf16.mxu1 %v549_v32  ;;  %v573_v4 = vpack.c.bf16 %v310_v2, %v308_v1  ;;  %v309_v6 = vld [vmem:[#allocation11 + $0x130] sm:$0xff]  ;;  %v312_v7 = vld [vmem:[#allocation11 + $0x148] sm:$0xff]  ;;  %v314_v8 = vld [vmem:[#allocation11 + $0x158] sm:$0xff]  ;;  %613 = vset.pattern.permute.xlu0 %v762_v60 }
  0x6d   :  { %v575_v9 = vpack.c.bf16 %v309_v6, %v307_v5  ;;  %v577_v10 = vpack.c.bf16 %v314_v8, %v312_v7  ;;  %v311_v11 = vld [vmem:[#allocation11 + $0x140] sm:$0xff]  ;;  %v313_v12 = vld [vmem:[#allocation11 + $0x150] sm:$0xff]  ;;  %v316_v13 = vld [vmem:[#allocation11 + $0x168] sm:$0xff] }
  0x6e   :  { %v318_v14 = vld [vmem:[#allocation11 + $0x178] sm:$0xff]  ;;  %v579_v15 = vpack.c.bf16 %v313_v12, %v311_v11  ;;  %v315_v17 = vld [vmem:[#allocation11 + $0x160] sm:$0xff]  ;;  %v317_v18 = vld [vmem:[#allocation11 + $0x170] sm:$0xff] }
  0x6f   :  { %552 = vmatpush1.bf16.msra.mxu1 %v551_v37  ;;  %v581_v16 = vpack.c.bf16 %v318_v14, %v316_v13  ;;  %v320_v19 = vld [vmem:[#allocation11 + $0x188] sm:$0xff]  ;;  %v322_v20 = vld [vmem:[#allocation11 + $0x198] sm:$0xff]  ;;  %v583_v21 = vpack.c.bf16 %v317_v18, %v315_v17  ;;  %v319_v23 = vld [vmem:[#allocation11 + $0x180] sm:$0xff] }
  0x70   :  { %554 = vmatprep.subr.bf16.mxu1 %v553_v38  ;;  %v585_v22 = vpack.c.bf16 %v322_v20, %v320_v19  ;;  %v321_v24 = vld [vmem:[#allocation11 + $0x190] sm:$0xff]  ;;  %v324_v25 = vld [vmem:[#allocation11 + $0x1a8] sm:$0xff]  ;;  %v326_v26 = vld [vmem:[#allocation11 + $0x1b8] sm:$0xff] }
  0x71   :  { %v587_v27 = vpack.c.bf16 %v321_v24, %v319_v23  ;;  %v589_v28 = vpack.c.bf16 %v326_v26, %v324_v25  ;;  %v323_v29 = vld [vmem:[#allocation11 + $0x1a0] sm:$0xff]  ;;  %v325_v30 = vld [vmem:[#allocation11 + $0x1b0] sm:$0xff]  ;;  %v328_v31 = vld [vmem:[#allocation11 + $0x1c8] sm:$0xff] }
  0x72   :  { %v330_v32 = vld [vmem:[#allocation11 + $0x1d8] sm:$0xff]  ;;  %v591_v33 = vpack.c.bf16 %v325_v30, %v323_v29  ;;  %v327_v35 = vld [vmem:[#allocation11 + $0x1c0] sm:$0xff]  ;;  %v329_v36 = vld [vmem:[#allocation11 + $0x1d0] sm:$0xff] }
  0x73   :  { %556 = vmatpush1.bf16.msra.mxu1 %v555_v43  ;;  %v593_v34 = vpack.c.bf16 %v330_v32, %v328_v31  ;;  %v595_v37 = vpack.c.bf16 %v329_v36, %v327_v35  ;;  %v332_v38 = vld [vmem:[#allocation11 + $0x1e8] sm:$0xff]  ;;  %v334_v39 = vld [vmem:[#allocation11 + $0x1f8] sm:$0xff]  ;;  %v331_v41 = vld [vmem:[#allocation11 + $0x1e0] sm:$0xff] }
  0x74   :  { %558 = vmatprep.subr.bf16.mxu1 %v557_v44  ;;  %v597_v40 = vpack.c.bf16 %v334_v39, %v332_v38  ;;  %v333_v42 = vld [vmem:[#allocation11 + $0x1f0] sm:$0xff]  ;;  %v257_v44 = vlaneseq  ;;  %v255_v47 = vld [vmem:[%s909_s4] sm:$0x3] }
  0x75   :  { %v599_v43 = vpack.c.bf16 %v333_v42, %v331_v41  ;;  %v420_v57 = vld [vmem:[%s912_s7] sm:$0x3]  ;;  %s763_s7 = smov [#allocation12]  }
  0x76   :  { %v258_v45 = vshrl.u32 %v257_v44, 7  ;;  %v421_v59 = vld [vmem:[#allocation2] sm:$0x1]  ;;  %s520_s26 = sshll.u32 %s763_s7, 4  ;;  %s521_s26 = int_to_ptr.vmem [resolvable:$true] %s520_s26 }
  0x77   :  { %560 = vmatpush1.bf16.msra.mxu1 %v559_v49  ;;  %424 = vperm.xlu0 %613, %v421_v59   ;;  %s728_s27 = scalar_lea.vmem %s521_s26, 32  ;;  %p729_p13 = scmp.lt.s32.totalorder %s521_s26, %s521_s26 }
  0x78   :  { %562 = vmatprep.subr.bf16.mxu1 %v561_v50  ;;  %v259_v46 = vsub.s32 0, %v258_v45  ;;  %v263_v48 = vsub.s32 1, %v258_v45 }
  0x7a   :  { %v260_v49 = vrot.slane %v255_v47, %v259_v46  ;;  %v264_v50 = vrot.slane %v255_v47, %v263_v48  ;;  %v439_v58 = vrot.slane %v420_v57, %v263_v48  ;;  %v435_v6 = vrot.slane %v420_v57, %v259_v46 }
  0x7b   :  { %564 = vmatpush1.bf16.msra.mxu1 %v563_v55 }
  0x7c   :  { %566 = vmatprep.subr.bf16.mxu1 %v565_v56  ;;  %506 = vmatprep.mubr.f32.mxu0 %v439_v58 }
  0x7f   :  { %568 = vmatpush1.bf16.msra.mxu1 %v567_v61  ;;  %v335_v61 = vld [vmem:[%s911_s6] sm:$0x3]  ;;  %s724_s6 = scalar_lea.vmem %s521_s26, 16 }
  0x80   :  { %570 = vmatprep.subr.bf16.mxu1 %v569_v62  ;;  %v340_v62 = vrot.slane %v335_v61, %v259_v46  ;;  %v344_v63 = vrot.slane %v335_v61, %v263_v48  ;;  %p725_p12 = scmp.ne.s32.totalorder %s521_s26, %s724_s6  ;;  %p730_p0 = scmp.lt.s32.totalorder %s728_s27, %s724_s6 }
  0x82   :  { %p731_p1 = por %p730_p0, %p729_p13 }
  0x83   :  { %572 = vmatpush1.bf16.msra.mxu1 %v571_v3 }
  0x84   :  { %574 = vmatprep.subr.bf16.mxu1 %v573_v4  ;;  %p732_p2 = pnand %p731_p1, %p725_p12 }
  0x87   :  { %576 = vmatpush1.bf16.msra.mxu1 %v575_v9 }
  0x88   :  { %578 = vmatprep.subr.bf16.mxu1 %v577_v10 }
  0x8b   :  { %580 = vmatpush1.bf16.msra.mxu1 %v579_v15 }
  0x8c   :  { %582 = vmatprep.subr.bf16.mxu1 %v581_v16 }
  0x8f   :  { %584 = vmatpush1.bf16.msra.mxu1 %v583_v21 }
  0x90   :  { %586 = vmatprep.subr.bf16.mxu1 %v585_v22 }
  0x93   :  { %588 = vmatpush1.bf16.msra.mxu1 %v587_v27 }
  0x94   :  { %590 = vmatprep.subr.bf16.mxu1 %v589_v28 }
  0x97   :  { %592 = vmatpush1.bf16.msra.mxu1 %v591_v33 }
  0x98   :  { %594 = vmatprep.subr.bf16.mxu1 %v593_v34 }
  0x9b   :  { %596 = vmatpush1.bf16.msra.mxu1 %v595_v37 }
  0x9c   :  { %598 = vmatprep.subr.bf16.mxu1 %v597_v40 }
  0x9f   :  { %600 = vmatpush1.bf16.msra.mxu1 %v599_v43 }
  0xf6   :  { %v425_v7 = vpop.permute.xlu0 %424 }
  0xf7   :  { %v430_v8 = vrot.slane %v425_v7, %v259_v46 }
 0x13a   :  { %v250_v51 = vpop.f32.mrb[0].mxu0 }
 0x13b   :  { %v267_v52 = vadd.f32 %v260_v49, %v250_v51  ;;  %v252_v53 = vpop.f32.mrb[1].mxu0 }
 0x13c   :  { %v268_v54 = vadd.f32 %v264_v50, %v252_v53 }
 0x13d   :  { %v269_v56 = vmax.f32 %v267_v52, 0.0 }
 0x13e   :  { %v270_v55 = vmax.f32 %v268_v54, 0.0 }
 0x140   :  { %411 = vmatprep.mubr.f32.mxu1 %v270_v55 }
 0x141   :  { %412 = vmatmul.mubr.f32.vlgmr.msra.gmra.mrb[0].mxu1 %v269_v56 }
 0x214   :  { %v413_v0 = vpop.f32.mrb[0].mxu1 }
 0x215   :  { %v414_v1 = vadd.f32 %v413_v0, %v340_v62  ;;  %v415_v2 = vpop.f32.mrb[1].mxu1 }
 0x216   :  { %v416_v3 = vadd.f32 %v415_v2, %v344_v63 }
 0x217   :  { %v418_v5 = vmax.f32 %v414_v1, 0.0 }
 0x218   :  { %v419_v4 = vmax.f32 %v416_v3, 0.0 }
 0x21a   :  { %442 = vmatprep.subr.mxu0 %v419_v4 }
 0x21b   :  { %443 = vmatpush1.xpose.msra.mxu0 %v418_v5 }
 0x21e   :  { %507 = vmatmul.mubr.f32.vlgmr.msra.gmra.mrb[2].mxu0 %v435_v6 }
 0x2f1   :  { %v508_v9 = vpop.f32.mrb[2].mxu0 }
 0x2f2   :  { %v509_v10 = vadd.f32 %v508_v9, %v430_v8  ;;  %v510_v11 = vpop.f32.mrb[3].mxu0 }
 0x2f4   :  { %513 = vst.msk [vmem:[#allocation12] sm:$0x1] %vm512_vm2, %v509_v10 }
 0x2f5   :  { %735 = shalt.err (!%p732_p2)
}
 0x2f6   :  { %s736_s30 = scalar_lea.hbm %s914_s9, 16 }
 0x2f7   :  { %p737_p3 = scmp.ne.s32.totalorder %s914_s9, %s736_s30  ;;  %p740_p4 = scmp.lt.u32.totalorder %s736_s30, %s914_s9 }
 0x2f9   :  { %p742_p5 = pnand %p740_p4, %p737_p3 }
 0x2fb   :  { %745 = shalt.err (!%p742_p5)
}
 0x2fc   :  { %523 = dma.vmem_to_hbm [thread:$0]  %s521_s26, 16, %s914_s9, [#allocation5]  }
 0x2fd   :  { %752 = dma.done.wait [#allocation5], 16  }
 0x2fe   :  { %753 = vsyncadd [#allocation5], 4294967280 }
 0x2ff   :  { %527 = vsyncpa [#allocation4], 1 }
 0x300   :  { %528 = vsyncpa [#allocation7], 1 }
 0x301   :  { %529 = vsyncpa [#allocation10], 1 }
 0x302   :  { %530 = vsyncpa [#allocation5], 1 }

</bundles_post_ra>
